<compile_context>
chip_gen: v6e
topology: v6e:2x2x1
jax: 0.10.0
libtpu: 0.0.40
codegen_flags: <defaults>
</compile_context>

<pallas_src>
import jax
import jax.numpy as jnp
from jax.experimental import pallas as pl
from jax.experimental.pallas import tpu as pltpu


def _round_up(x, m):
    return (x + m - 1) // m * m


def _cdiv(a, b):
    return -(-a // b)


def _vmem_budget_bytes():
    """~3/4 of the chip's physical per-core VMEM (v5e/v6e: 128 MiB, v7x: 64 MiB)."""
    cap = 64 * 1024 * 1024
    try:
        info = pltpu.get_tpu_info()
        cap = int(getattr(info, "vmem_capacity_bytes", cap))
    except Exception:
        pass
    return (cap * 3) // 4


# --------------------------------------------------------------------------
# Kernels
# --------------------------------------------------------------------------
def _resnet_stack_resident_kernel(x_ref, w1_ref, b1_ref, w2_ref, b2_ref, o_ref):
    """Weight-resident path: grid=(batch tiles,).  All N units' weights live in
    VMEM (constant index_map); the unit sweep is an in-kernel static loop, so the
    activation never leaves vregs/VMEM between units."""
    n_units = w1_ref.shape[0]
    act = x_ref[...].astype(jnp.float32)                 # [TB, Dp] f32 residual carry
    for n in range(n_units):                             # static unroll (N is small)
        # Linear1 + ReLU (bf16 MXU inputs, f32 accumulation & elementwise)
        h = jnp.dot(act.astype(jnp.bfloat16), w1_ref[n],
                    preferred_element_type=jnp.float32)  # [TB, Hp]
        h = jnp.maximum(h + b1_ref[n], 0.0)
        # Dropout (eval mode): identity.
        # Linear2
        y = jnp.dot(h.astype(jnp.bfloat16), w2_ref[n],
                    preferred_element_type=jnp.float32)  # [TB, Dp]
        y = y + b2_ref[n]
        # residual add + final ReLU
        act = jnp.maximum(y + act, 0.0)
    o_ref[...] = act.astype(o_ref.dtype)


def _resnet_unit_streaming_kernel(x_ref, w1_ref, b1_ref, w2_ref, b2_ref,
                                  o_ref, act_ref):
    """Fallback path (weights too large for VMEM residency): grid=(batch tile b,
    unit n).  Weights are streamed per unit; the activation stays resident in a
    VMEM scratch across the unit sweep.  Weight refs are 2-D (leading unit dim
    squeezed via block_shape entry None)."""
    n = pl.program_id(1)

    @pl.when(n == 0)
    def _():
        act_ref[...] = x_ref[...].astype(jnp.float32)

    x = act_ref[...]                                     # [TB, Dp] f32
    h = jnp.dot(x.astype(jnp.bfloat16), w1_ref[...],
                preferred_element_type=jnp.float32)      # [TB, Hp]
    h = jnp.maximum(h + b1_ref[...], 0.0)
    # Dropout (eval mode): identity.
    y = jnp.dot(h.astype(jnp.bfloat16), w2_ref[...],
                preferred_element_type=jnp.float32)      # [TB, Dp]
    y = y + b2_ref[...]
    out = jnp.maximum(y + x, 0.0)
    act_ref[...] = out

    @pl.when(n == pl.num_programs(1) - 1)
    def _():
        o_ref[...] = out.astype(o_ref.dtype)


# --------------------------------------------------------------------------
# Host-side wrappers
# --------------------------------------------------------------------------
def prepare_resnet_params(w1s, b1s, w2s, b2s):
    """Pad feature dims to multiples of 128 (lane-dense) and cast weights to bf16.
    Do this ONCE and cache the result; it is out of the forward hot path.

    w1s: [N, D, H]  (input-major, i.e. transposed nn.Linear.weight)
    b1s: [N, H]
    w2s: [N, H, D]
    b2s: [N, D]
    """
    N, D, H = w1s.shape
    Dp = _round_up(D, 128)
    Hp = _round_up(H, 128)
    w1p = jnp.zeros((N, Dp, Hp), jnp.bfloat16).at[:, :D, :H].set(
        w1s.astype(jnp.bfloat16))
    w2p = jnp.zeros((N, Hp, Dp), jnp.bfloat16).at[:, :H, :D].set(
        w2s.astype(jnp.bfloat16))
    b1p = jnp.zeros((N, 1, Hp), jnp.float32).at[:, 0, :H].set(
        b1s.astype(jnp.float32))
    b2p = jnp.zeros((N, 1, Dp), jnp.float32).at[:, 0, :D].set(
        b2s.astype(jnp.float32))
    return dict(w1=w1p, b1=b1p, w2=w2p, b2=b2p, D=D, H=H)


def _fits_vmem(tb, resident, *, n_units, Dp, Hp, x_item, out_item, budget):
    io_tiles = 2 * tb * Dp * (x_item + out_item)          # double-buffered x/out blocks
    scratch = 0 if resident else tb * Dp * 4              # persistent act scratch (fallback)
    interm = 4 * tb * max(Dp, Hp) * 4                     # f32 temporaries headroom
    wn = n_units if resident else 1
    weights = 2 * (wn * (Dp * Hp + Hp * Dp) * 2           # bf16, double-buffered
                   + wn * (Hp + Dp) * 4)                  # f32 biases
    return io_tiles + scratch + interm + weights <= budget


def resnet_forward_prepared(x, params, *, batch_tile=1024,
                            force_weight_streaming=False):
    """Fused DeepCrossing residual stack on pre-padded params (hot path).

    x: [B, D] activations.  Returns [B, D].
    """
    w1p, b1p, w2p, b2p = params["w1"], params["b1"], params["w2"], params["b2"]
    D, H = params["D"], params["H"]
    N, Dp, Hp = w1p.shape
    B = x.shape[0]
    assert x.shape[1] == D, "input feature dim mismatch"
    out_dtype = x.dtype
    x_item = jnp.dtype(x.dtype).itemsize
    out_item = jnp.dtype(out_dtype).itemsize

    budget = _vmem_budget_bytes()

    # ---- balanced batch tiling: TB multiple of 16, >=2 tiles for larger B ----
    n_tiles = _cdiv(B, max(16, batch_tile))
    if B >= 64:
        n_tiles = max(n_tiles, 2)   # let the "parallel" axis shard across 2 TCs (v7x)
    TB0 = _round_up(_cdiv(B, n_tiles), 16)

    def fits(tb, resident):
        return _fits_vmem(tb, resident, n_units=N, Dp=Dp, Hp=Hp,
                          x_item=x_item, out_item=out_item, budget=budget)

    # ---- pick weight residency / shrink TB to fit the chip's VMEM budget ----
    resident = not force_weight_streaming
    TB = TB0
    if resident:
        while TB > 16 and not fits(TB, True):
            TB = max(16, _round_up(TB // 2, 16))
        if not fits(TB, True):
            resident = False
    if not resident:
        TB = TB0
        while TB > 16 and not fits(TB, False):
            TB = max(16, _round_up(TB // 2, 16))

    Bp = _round_up(B, TB)
    n_batch_tiles = Bp // TB

    # x padding is the only per-call host-side prep (weights already padded).
    xp = jnp.zeros((Bp, Dp), x.dtype).at[:B, :D].set(x)

    # ---- advisory cost estimate for the XLA scheduler ----
    w_bytes = (w1p.size + w2p.size) * 2 + (b1p.size + b2p.size) * 4
    weight_fetches = 1 if resident else n_batch_tiles
    cost = pl.CostEstimate(
        flops=2 * Bp * N * (Dp * Hp + Hp * Dp),
        transcendentals=0,
        bytes_accessed=Bp * Dp * (x_item + out_item) + weight_fetches * w_bytes,
    )

    if resident:
        kernel = _resnet_stack_resident_kernel
        grid = (n_batch_tiles,)
        in_specs = [
            pl.BlockSpec((TB, Dp), lambda b: (b, 0)),          # x tile
            pl.BlockSpec((N, Dp, Hp), lambda b: (0, 0, 0)),    # w1 stack (VMEM-resident)
            pl.BlockSpec((N, 1, Hp), lambda b: (0, 0, 0)),     # b1 stack
            pl.BlockSpec((N, Hp, Dp), lambda b: (0, 0, 0)),    # w2 stack
            pl.BlockSpec((N, 1, Dp), lambda b: (0, 0, 0)),     # b2 stack
        ]
        out_specs = pl.BlockSpec((TB, Dp), lambda b: (b, 0))
        scratch_shapes = []
        dim_sem = ("parallel",)
    else:
        kernel = _resnet_unit_streaming_kernel
        grid = (n_batch_tiles, N)
        in_specs = [
            pl.BlockSpec((TB, Dp), lambda b, n: (b, 0)),       # x (resident per tile)
            pl.BlockSpec((None, Dp, Hp), lambda b, n: (n, 0, 0)),  # w1[n] (squeezed -> 2-D)
            pl.BlockSpec((None, 1, Hp), lambda b, n: (n, 0, 0)),   # b1[n]
            pl.BlockSpec((None, Hp, Dp), lambda b, n: (n, 0, 0)),  # w2[n]
            pl.BlockSpec((None, 1, Dp), lambda b, n: (n, 0, 0)),   # b2[n]
        ]
        out_specs = pl.BlockSpec((TB, Dp), lambda b, n: (b, 0))
        scratch_shapes = [pltpu.VMEM((TB, Dp), jnp.float32)]
        dim_sem = ("parallel", "arbitrary")

    out = pl.pallas_call(
        kernel,
        out_shape=jax.ShapeDtypeStruct((Bp, Dp), out_dtype),
        grid_spec=pltpu.PrefetchScalarGridSpec(
            num_scalar_prefetch=0,
            grid=grid,
            in_specs=in_specs,
            out_specs=out_specs,
            scratch_shapes=scratch_shapes,
        ),
        compiler_params=pltpu.CompilerParams(
            dimension_semantics=dim_sem,
            vmem_limit_bytes=int(budget),
        ),
        cost_estimate=cost,
    )(xp, w1p, b1p, w2p, b2p)

    return out[:B, :D]


def resnet_forward(x, w1s, b1s, w2s, b2s, **kwargs):
    """Convenience wrapper (pads/casts weights per call).  For repeated calls,
    call prepare_resnet_params() once and use resnet_forward_prepared()."""
    return resnet_forward_prepared(x, prepare_resnet_params(w1s, b1s, w2s, b2s),
                                   **kwargs)


def reference_forward(x, w1s, b1s, w2s, b2s, match_kernel_dtypes=True):
    """Pure-JAX reference.  match_kernel_dtypes=True mimics the kernel's
    bf16-matmul / f32-elementwise numerics; False is the full-f32 spec."""
    h = x.astype(jnp.float32)
    for n in range(w1s.shape[0]):
        w1, w2 = w1s[n], w2s[n]
        if match_kernel_dtypes:
            a = jnp.dot(h.astype(jnp.bfloat16), w1.astype(jnp.bfloat16),
                        preferred_element_type=jnp.float32)
        else:
            a = h @ w1
        a = jnp.maximum(a + b1s[n][None, :], 0.0)
        if match_kernel_dtypes:
            y = jnp.dot(a.astype(jnp.bfloat16), w2.astype(jnp.bfloat16),
                        preferred_element_type=jnp.float32)
        else:
            y = a @ w2
        y = y + b2s[n][None, :]
        h = jnp.maximum(y + h, 0.0)
    return h


if __name__ == "__main__":
    B, input_dim, hidden_unit = 8, 32, 64

    key = jax.random.PRNGKey(0)
    kx, kw1, kb1, kw2, kb2 = jax.random.split(key, 5)
    x = jax.random.normal(kx, (B, input_dim), dtype=jnp.float32)

    # Single ResNet unit (N=1): same shapes as nn.Linear(input_dim, hidden_unit)
    # / nn.Linear(hidden_unit, input_dim), weights stored [in, out].
    w1s = jax.random.normal(kw1, (1, input_dim, hidden_unit), jnp.float32) * 0.1
    b1s = jax.random.normal(kb1, (1, hidden_unit), jnp.float32) * 0.1
    w2s = jax.random.normal(kw2, (1, hidden_unit, input_dim), jnp.float32) * 0.1
    b2s = jax.random.normal(kb2, (1, input_dim), jnp.float32) * 0.1

    params1 = prepare_resnet_params(w1s, b1s, w2s, b2s)   # pad/cast once (cached)
    out = jax.block_until_ready(resnet_forward_prepared(x, params1))
    assert out.shape == (B, input_dim)
    ref_bf16 = reference_forward(x, w1s, b1s, w2s, b2s, match_kernel_dtypes=True)
    ref_f32 = reference_forward(x, w1s, b1s, w2s, b2s, match_kernel_dtypes=False)
    assert jnp.allclose(out, ref_bf16, atol=1e-3, rtol=1e-3), "mismatch vs bf16-matched ref"
    assert jnp.allclose(out, ref_f32, atol=5e-2, rtol=5e-2), "mismatch vs f32 reference"

    # Fused multi-unit stack (DeepCrossing-style): N=3 residual units, one call.
    N = 3
    ks = jax.random.split(jax.random.PRNGKey(1), 4)
    w1m = jax.random.normal(ks[0], (N, input_dim, hidden_unit), jnp.float32) * 0.1
    b1m = jax.random.normal(ks[1], (N, hidden_unit), jnp.float32) * 0.1
    w2m = jax.random.normal(ks[2], (N, hidden_unit, input_dim), jnp.float32) * 0.1
    b2m = jax.random.normal(ks[3], (N, input_dim), jnp.float32) * 0.1
    paramsN = prepare_resnet_params(w1m, b1m, w2m, b2m)
    ref_m = reference_forward(x, w1m, b1m, w2m, b2m, match_kernel_dtypes=True)

    # Weight-resident path (default).
    out_res = jax.block_until_ready(resnet_forward_prepared(x, paramsN))
    assert out_res.shape == (B, input_dim)
    assert jnp.allclose(out_res, ref_m, atol=1e-3, rtol=1e-3), "mismatch (resident stack)"

    # Streaming fallback path (forced, for coverage).
    out_stream = jax.block_until_ready(
        resnet_forward_prepared(x, paramsN, force_weight_streaming=True))
    assert jnp.allclose(out_stream, ref_m, atol=1e-3, rtol=1e-3), "mismatch (streaming stack)"

    # Larger batch: multiple balanced tiles on the "parallel" batch axis.
    xb = jax.random.normal(jax.random.PRNGKey(2), (300, input_dim), jnp.float32)
    out_b = jax.block_until_ready(
        resnet_forward_prepared(xb, paramsN, batch_tile=128))
    ref_b = reference_forward(xb, w1m, b1m, w2m, b2m, match_kernel_dtypes=True)
    assert out_b.shape == (300, input_dim)
    assert jnp.allclose(out_b, ref_b, atol=1e-3, rtol=1e-3), "mismatch (multi-tile batch)"

    print("KERNEL_OK")
</pallas_src>

<mosaic_0001>
module attributes {stable_mosaic.version = 11 : i64} {
  func.func @_resnet_stack_resident_kernel(%arg0: i32, %arg1: memref<16x128xf32, #tpu.memory_space<vmem>>, %arg2: memref<1x128x128xbf16, #tpu.memory_space<vmem>>, %arg3: memref<1x1x128xf32, #tpu.memory_space<vmem>>, %arg4: memref<1x128x128xbf16, #tpu.memory_space<vmem>>, %arg5: memref<1x1x128xf32, #tpu.memory_space<vmem>>, %arg6: memref<16x128xf32, #tpu.memory_space<vmem>>) attributes {dimension_semantics = [#tpu.dimension_semantics<parallel>], iteration_bounds = array<i64: 1>, scalar_prefetch = 0 : i64, scratch_operands = 0 : i64, tpu.core_type = #tpu.core_type<tc>, window_params = [{transform_indices = @transform_0, window_bounds = array<i64: 16, 128>}, {pipeline_mode = #tpu.pipeline_mode<synchronous>, transform_indices = @transform_1, window_bounds = array<i64: 1, 128, 128>}, {pipeline_mode = #tpu.pipeline_mode<synchronous>, transform_indices = @transform_2, window_bounds = array<i64: 1, 1, 128>}, {pipeline_mode = #tpu.pipeline_mode<synchronous>, transform_indices = @transform_3, window_bounds = array<i64: 1, 128, 128>}, {pipeline_mode = #tpu.pipeline_mode<synchronous>, transform_indices = @transform_4, window_bounds = array<i64: 1, 1, 128>}, {transform_indices = @transform_5, window_bounds = array<i64: 16, 128>}]} {
    %c0 = arith.constant 0 : index
    %c0_0 = arith.constant 0 : index
    %0 = vector.load %arg1[%c0, %c0_0] : memref<16x128xf32, #tpu.memory_space<vmem>>, vector<16x128xf32>
    %1 = arith.truncf %0 : vector<16x128xf32> to vector<16x128xbf16>
    %c0_1 = arith.constant 0 : index
    %c0_2 = arith.constant 0 : index
    %c0_3 = arith.constant 0 : index
    %2 = vector.load %arg2[%c0_1, %c0_2, %c0_3] : memref<1x128x128xbf16, #tpu.memory_space<vmem>>, vector<1x128x128xbf16>
    %3 = vector.shape_cast %2 : vector<1x128x128xbf16> to vector<128x128xbf16>
    %cst = arith.constant dense<0.000000e+00> : vector<16x128xf32>
    %4 = tpu.matmul %1, %3, %cst {dimension_numbers = #tpu.dot_dimension_numbers<[1], [0], [0], [1], [0, 0, 1, 1], [], []>} : vector<16x128xbf16>, vector<128x128xbf16>, vector<16x128xf32> -> vector<16x128xf32>
    %c0_4 = arith.constant 0 : index
    %c0_5 = arith.constant 0 : index
    %c0_6 = arith.constant 0 : index
    %5 = vector.load %arg3[%c0_4, %c0_5, %c0_6] : memref<1x1x128xf32, #tpu.memory_space<vmem>>, vector<1x1x128xf32>
    %6 = vector.shape_cast %5 : vector<1x1x128xf32> to vector<1x128xf32>
    %7 = vector.broadcast %6 : vector<1x128xf32> to vector<16x128xf32>
    %8 = arith.addf %4, %7 : vector<16x128xf32>
    %cst_7 = arith.constant 0.000000e+00 : f32
    %9 = vector.broadcast %cst_7 : f32 to vector<16x128xf32>
    %10 = arith.maximumf %8, %9 : vector<16x128xf32>
    %11 = arith.truncf %10 : vector<16x128xf32> to vector<16x128xbf16>
    %c0_8 = arith.constant 0 : index
    %c0_9 = arith.constant 0 : index
    %c0_10 = arith.constant 0 : index
    %12 = vector.load %arg4[%c0_8, %c0_9, %c0_10] : memref<1x128x128xbf16, #tpu.memory_space<vmem>>, vector<1x128x128xbf16>
    %13 = vector.shape_cast %12 : vector<1x128x128xbf16> to vector<128x128xbf16>
    %cst_11 = arith.constant dense<0.000000e+00> : vector<16x128xf32>
    %14 = tpu.matmul %11, %13, %cst_11 {dimension_numbers = #tpu.dot_dimension_numbers<[1], [0], [0], [1], [0, 0, 1, 1], [], []>} : vector<16x128xbf16>, vector<128x128xbf16>, vector<16x128xf32> -> vector<16x128xf32>
    %c0_12 = arith.constant 0 : index
    %c0_13 = arith.constant 0 : index
    %c0_14 = arith.constant 0 : index
    %15 = vector.load %arg5[%c0_12, %c0_13, %c0_14] : memref<1x1x128xf32, #tpu.memory_space<vmem>>, vector<1x1x128xf32>
    %16 = vector.shape_cast %15 : vector<1x1x128xf32> to vector<1x128xf32>
    %17 = vector.broadcast %16 : vector<1x128xf32> to vector<16x128xf32>
    %18 = arith.addf %14, %17 : vector<16x128xf32>
    %19 = arith.addf %18, %0 : vector<16x128xf32>
    %cst_15 = arith.constant 0.000000e+00 : f32
    %20 = vector.broadcast %cst_15 : f32 to vector<16x128xf32>
    %21 = arith.maximumf %19, %20 : vector<16x128xf32>
    %c0_16 = arith.constant 0 : index
    %c0_17 = arith.constant 0 : index
    %22 = vector.load %arg6[%c0_16, %c0_17] : memref<16x128xf32, #tpu.memory_space<vmem>>, vector<16x128xf32>
    tpu.vector_store %arg6[%c0_16, %c0_17], %21 {strides = array<i32>} : memref<16x128xf32, #tpu.memory_space<vmem>>, vector<16x128xf32>,
    return
  }
  func.func @transform_0(%arg0: i32) -> (i32, i32) {
    %c0_i32 = arith.constant 0 : i32
    %c0_i32_0 = arith.constant 0 : i32
    return %arg0, %c0_i32 : i32, i32
  }
  func.func @transform_1(%arg0: i32) -> (i32, i32, i32) {
    %c0_i32 = arith.constant 0 : i32
    %c0_i32_0 = arith.constant 0 : i32
    %c0_i32_1 = arith.constant 0 : i32
    %c0_i32_2 = arith.constant 0 : i32
    return %c0_i32, %c0_i32_0, %c0_i32_1 : i32, i32, i32
  }
  func.func @transform_2(%arg0: i32) -> (i32, i32, i32) {
    %c0_i32 = arith.constant 0 : i32
    %c0_i32_0 = arith.constant 0 : i32
    %c0_i32_1 = arith.constant 0 : i32
    %c0_i32_2 = arith.constant 0 : i32
    return %c0_i32, %c0_i32_0, %c0_i32_1 : i32, i32, i32
  }
  func.func @transform_3(%arg0: i32) -> (i32, i32, i32) {
    %c0_i32 = arith.constant 0 : i32
    %c0_i32_0 = arith.constant 0 : i32
    %c0_i32_1 = arith.constant 0 : i32
    %c0_i32_2 = arith.constant 0 : i32
    return %c0_i32, %c0_i32_0, %c0_i32_1 : i32, i32, i32
  }
  func.func @transform_4(%arg0: i32) -> (i32, i32, i32) {
    %c0_i32 = arith.constant 0 : i32
    %c0_i32_0 = arith.constant 0 : i32
    %c0_i32_1 = arith.constant 0 : i32
    %c0_i32_2 = arith.constant 0 : i32
    return %c0_i32, %c0_i32_0, %c0_i32_1 : i32, i32, i32
  }
  func.func @transform_5(%arg0: i32) -> (i32, i32) {
    %c0_i32 = arith.constant 0 : i32
    %c0_i32_0 = arith.constant 0 : i32
    return %arg0, %c0_i32 : i32, i32
  }
}

</mosaic_0001>

<bundles_post_ra>
// kernel: tpu_custom_call.1
= control target key start
LH: loop header
LB: loop body
LE: loop exit
PB: predicated region body
PF: predicated region fallthrough
CT: control target
= control target key end

     0   :  { %10 = vsyncpa [#allocation3], 0  ;;  %s569_s0 = inlined_call_operand.hbm [shape: f32[16,128], index: 0, kind: input, shape index: {}]   ;;  %s570_s1 = inlined_call_operand.hbm [shape: bf16[1,128,128], index: 1, kind: input, shape index: {}]   ;;  %s571_s2 = inlined_call_operand.vmem [shape: f32[1,1,128], index: 2, kind: input, shape index: {}]   ;;  %s572_s3 = inlined_call_operand.hbm [shape: bf16[1,128,128], index: 3, kind: input, shape index: {}]   ;;  %s573_s4 = inlined_call_operand.vmem [shape: f32[1,1,128], index: 4, kind: input, shape index: {}]   ;;  %s574_s5 = inlined_call_operand.hbm [shape: f32[16,128], index: 5, kind: output, shape index: {}]  }
   0x1   :  { %11 = vsyncpa [#allocation6], 0 }
   0x2   :  { %12 = vsyncpa [#allocation4], 0  ;;  %s505_s18 = smov [#allocation5]  }
   0x3   :  { %s30_s19 = sshll.u32 %s505_s18, 4  ;;  %s31_s19 = int_to_ptr.vmem [resolvable:$true] %s30_s19 }
   0x4   :  { %s427_s20 = scalar_lea.vmem %s31_s19, 1024  ;;  %p432_p1 = scmp.lt.s32.totalorder %s31_s19, %s31_s19 }
   0x5   :  { %p428_p0 = scmp.ne.s32.totalorder %s31_s19, %s427_s20  ;;  %p433_p2 = scmp.lt.s32.totalorder %s427_s20, %s427_s20 }
   0x7   :  { %p434_p3 = por %p433_p2, %p432_p1 }
   0x9   :  { %p435_p4 = pnand %p434_p3, %p428_p0 }
   0xb   :  { %438 = shalt.err (!%p435_p4)
}
   0xc   :  { %s506_s21 = smov 64   ;;  %s507_s22 = smov 4  }
   0xd   :  { %36 = dma.hbm_to_vmem [thread:$0]  %s570_s1, 1024, %s31_s19, [#allocation6], %s506_s21, %s506_s21, %s507_s22  }
   0xe   :  { %s508_s25 = smov [#allocation2]  }
   0xf   :  { %s18_s26 = sshll.u32 %s508_s25, 4  ;;  %s19_s26 = int_to_ptr.vmem [resolvable:$true] %s18_s26 }
  0x10   :  { %s447_s27 = scalar_lea.vmem %s19_s26, 256  ;;  %p452_p6 = scmp.lt.s32.totalorder %s19_s26, %s19_s26 }
  0x11   :  { %p448_p5 = scmp.ne.s32.totalorder %s19_s26, %s447_s27  ;;  %p453_p7 = scmp.lt.s32.totalorder %s447_s27, %s447_s27 }
  0x13   :  { %p454_p8 = por %p453_p7, %p452_p6 }
  0x15   :  { %p455_p9 = pnand %p454_p8, %p448_p5 }
  0x17   :  { %458 = shalt.err (!%p455_p9)
}
  0x18   :  { %s509_s28 = smov 128   ;;  %s510_s29 = smov 8  }
  0x19   :  { %24 = dma.hbm_to_vmem [thread:$0]  %s569_s0, 256, %s19_s26, [#allocation3], %s509_s28, %s509_s28, %s510_s29  }
  0x1a   :  { %s511_s1 = smov [#allocation7]  }
  0x1b   :  { %s44_s7 = sshll.u32 %s511_s1, 4  ;;  %s45_s7 = int_to_ptr.vmem [resolvable:$true] %s44_s7 }
  0x1c   :  { %s467_s8 = scalar_lea.vmem %s45_s7, 1024  ;;  %p472_p11 = scmp.lt.s32.totalorder %s45_s7, %s45_s7 }
  0x1d   :  { %p468_p10 = scmp.ne.s32.totalorder %s45_s7, %s467_s8  ;;  %p473_p12 = scmp.lt.s32.totalorder %s467_s8, %s467_s8 }
  0x1f   :  { %p474_p13 = por %p473_p12, %p472_p11 }
  0x21   :  { %p475_p0 = pnand %p474_p13, %p468_p10 }
  0x23   :  { %478 = shalt.err (!%p475_p0)
}
  0x24   :  { %50 = dma.hbm_to_vmem [thread:$0]  %s572_s3, 1024, %s45_s7, [#allocation6], %s506_s21, %s506_s21, %s507_s22  }
  0x25   :  { %499 = dma.done.wait [#allocation3], 256  }
  0x26   :  { %500 = vsyncadd [#allocation3], 4294967040 }
  0x27   :  { %501 = dma.done.wait [#allocation6], 2048  }
  0x28   :  { %502 = vsyncadd [#allocation6], 4294965248  ;;  %v512_v0 = vmov 0.0   ;;  %vm513_vm0 = vmmov 0   ;;  %v403_v1 = vld [vmem:[#allocation5 + $0x38] sm:$0xff]   ;;  %v404_v2 = vld [vmem:[#allocation5 + $0x30] sm:$0xff]  }
  0x29   :  { %353 = vmatprep.subr.bf16.mxu0 %v512_v0  ;;  %369 = vmatprep.mubr.msk.bf16.mxu0 %vm513_vm0, %v512_v0  ;;  %v405_v3 = vld [vmem:[#allocation5 + $0x28] sm:$0xff]   ;;  %v411_v4 = vld [vmem:[#allocation7 + $0x38] sm:$0xff]   ;;  %v406_v5 = vld [vmem:[#allocation5 + $0x20] sm:$0xff]  }
  0x2a   :  { %373 = vmatprep.subr.bf16.mxu1 %v512_v0  ;;  %389 = vmatprep.mubr.msk.bf16.mxu1 %vm513_vm0, %v512_v0  ;;  %v412_v6 = vld [vmem:[#allocation7 + $0x30] sm:$0xff]   ;;  %v407_v7 = vld [vmem:[#allocation5 + $0x18] sm:$0xff]   ;;  %v413_v8 = vld [vmem:[#allocation7 + $0x28] sm:$0xff]  }
  0x2b   :  { %354 = vmatpush3.bf16.msra.mxu0 %v403_v1  ;;  %374 = vmatpush3.bf16.msra.mxu1 %v411_v4  ;;  %v408_v9 = vld [vmem:[#allocation5 + $0x10] sm:$0xff]   ;;  %v414_v10 = vld [vmem:[#allocation7 + $0x20] sm:$0xff]   ;;  %v409_v11 = vld [vmem:[#allocation5 + $0x8] sm:$0xff]  }
  0x2c   :  { %355 = vmatprep.subr.bf16.mxu0 %v512_v0  ;;  %375 = vmatprep.subr.bf16.mxu1 %v512_v0  ;;  %v415_v12 = vld [vmem:[#allocation7 + $0x18] sm:$0xff]   ;;  %v410_v13 = vld [vmem:[#allocation5] sm:$0xff]   ;;  %v63_v14 = vld [vmem:[#allocation2] sm:$0xff] }
  0x2d   :  { %v64_v15 = vld [vmem:[#allocation2 + $0x8] sm:$0xff]  ;;  %v416_v17 = vld [vmem:[#allocation7 + $0x10] sm:$0xff]   ;;  %v417_v18 = vld [vmem:[#allocation7 + $0x8] sm:$0xff]  }
  0x2e   :  { %v65_v16 = vpack.c.bf16 %v64_v15, %v63_v14  ;;  %v418_v19 = vld [vmem:[#allocation7] sm:$0xff]   ;;  %v317_v20 = vld [vmem:[%s571_s2] ss:$0 sm:$0xff]  ;;  %s514_s2 = smov [#allocation8]  }
  0x2f   :  { %356 = vmatpush3.bf16.msra.mxu0 %v404_v2  ;;  %376 = vmatpush3.bf16.msra.mxu1 %v412_v6  ;;  %v326_v30 = vld [vmem:[%s573_s4] ss:$0 sm:$0xff]  ;;  %s304_s13 = sshll.u32 %s514_s2, 4  ;;  %s305_s13 = int_to_ptr.vmem [resolvable:$true] %s304_s13 }
  0x30   :  { %357 = vmatprep.subr.bf16.mxu0 %v512_v0  ;;  %377 = vmatprep.subr.bf16.mxu1 %v512_v0  ;;  %s479_s14 = scalar_lea.vmem %s305_s13, 256  ;;  %p484_p2 = scmp.lt.s32.totalorder %s305_s13, %s305_s13 }
  0x31   :  { %p480_p1 = scmp.ne.s32.totalorder %s305_s13, %s479_s14  ;;  %p485_p3 = scmp.lt.s32.totalorder %s479_s14, %s479_s14 }
  0x33   :  { %358 = vmatpush3.bf16.msra.mxu0 %v405_v3  ;;  %378 = vmatpush3.bf16.msra.mxu1 %v413_v8  ;;  %p486_p4 = por %p485_p3, %p484_p2 }
  0x34   :  { %359 = vmatprep.subr.bf16.mxu0 %v512_v0  ;;  %379 = vmatprep.subr.bf16.mxu1 %v512_v0 }
  0x35   :  { %p487_p5 = pnand %p486_p4, %p480_p1 }
  0x37   :  { %360 = vmatpush3.bf16.msra.mxu0 %v406_v5  ;;  %380 = vmatpush3.bf16.msra.mxu1 %v414_v10 }
  0x38   :  { %361 = vmatprep.subr.bf16.mxu0 %v512_v0  ;;  %381 = vmatprep.subr.bf16.mxu1 %v512_v0 }
  0x3b   :  { %362 = vmatpush3.bf16.msra.mxu0 %v407_v7  ;;  %382 = vmatpush3.bf16.msra.mxu1 %v415_v12 }
  0x3c   :  { %363 = vmatprep.subr.bf16.mxu0 %v512_v0  ;;  %383 = vmatprep.subr.bf16.mxu1 %v512_v0 }
  0x3f   :  { %364 = vmatpush3.bf16.msra.mxu0 %v408_v9  ;;  %384 = vmatpush3.bf16.msra.mxu1 %v416_v17 }
  0x40   :  { %365 = vmatprep.subr.bf16.mxu0 %v512_v0  ;;  %385 = vmatprep.subr.bf16.mxu1 %v512_v0 }
  0x43   :  { %366 = vmatpush3.bf16.msra.mxu0 %v409_v11  ;;  %386 = vmatpush3.bf16.msra.mxu1 %v417_v18 }
  0x44   :  { %367 = vmatprep.subr.bf16.mxu0 %v512_v0  ;;  %387 = vmatprep.subr.bf16.mxu1 %v512_v0 }
  0x47   :  { %368 = vmatpush3.bf16.msra.mxu0 %v410_v13  ;;  %388 = vmatpush3.bf16.msra.mxu1 %v418_v19 }
  0x4a   :  { %370 = vmatmul.mubr.bf16.vlgmr.msra.gmra.mxu0 %v65_v16 }
 0x10a   :  { %v171_v21 = vpop.f32.mrf.mxu0 }
 0x10b   :  { %v172_v23 = vadd.f32 %v317_v20, %v171_v21 }
 0x10c   :  { %v371_v22 = vpop.f32.mrf.mxu0 }
 0x10d   :  { %v178_v27 = vmax.f32 %v172_v23, 0.0 }
 0x10e   :  { %v174_v24 = vpop.f32.mrf.mxu0 }
 0x10f   :  { %v175_v25 = vadd.f32 %v317_v20, %v174_v24 }
 0x110   :  { %v372_v26 = vpop.f32.mrf.mxu0 }
 0x111   :  { %v179_v28 = vmax.f32 %v175_v25, 0.0 }
 0x113   :  { %v180_v29 = vpack.c.bf16 %v179_v28, %v178_v27 }
 0x115   :  { %390 = vmatmul.mubr.bf16.vlgmr.msra.gmra.mxu1 %v180_v29 }
 0x1d5   :  { %v286_v31 = vpop.f32.mrf.mxu1 }
 0x1d6   :  { %v287_v32 = vadd.f32 %v326_v30, %v286_v31 }
 0x1d7   :  { %v391_v33 = vpop.f32.mrf.mxu1 }
 0x1d8   :  { %v293_v34 = vadd.f32 %v287_v32, %v63_v14 }
 0x1d9   :  { %v289_v35 = vpop.f32.mrf.mxu1 }
 0x1da   :  { %v295_v36 = vmax.f32 %v293_v34, 0.0  ;;  %v290_v37 = vadd.f32 %v326_v30, %v289_v35 }
 0x1db   :  { %v392_v38 = vpop.f32.mrf.mxu1 }
 0x1dc   :  { %297 = vst [vmem:[#allocation8] sm:$0xff] %v295_v36  ;;  %v294_v39 = vadd.f32 %v290_v37, %v64_v15 }
 0x1de   :  { %v296_v40 = vmax.f32 %v294_v39, 0.0 }
 0x1e0   :  { %298 = vst [vmem:[#allocation8 + $0x8] sm:$0xff] %v296_v40 }
 0x1e1   :  { %490 = shalt.err (!%p487_p5)
}
 0x1e2   :  { %310 = dma.vmem_to_hbm [thread:$0]  %s305_s13, 256, %s574_s5, [#allocation4], %s509_s28, %s509_s28, %s510_s29  }
 0x1e3   :  { %503 = dma.done.wait [#allocation4], 256  }
 0x1e4   :  { %504 = vsyncadd [#allocation4], 4294967040 }
 0x1e5   :  { %314 = vsyncpa [#allocation3], 1 }
 0x1e6   :  { %315 = vsyncpa [#allocation6], 1 }
 0x1e7   :  { %316 = vsyncpa [#allocation4], 1 }

</bundles_post_ra>
